<compile_context>
chip_gen: v7x
topology: tpu7x:2x2x1
jax: 0.10.0
libtpu: 0.0.40
codegen_flags: <defaults>
</compile_context>

<pallas_src>
import functools
import math

import jax
import jax.numpy as jnp
from jax import lax
from jax.experimental import pallas as pl
from jax.experimental.pallas import tpu as pltpu


def _round_up(a, b):
    return (a + b - 1) // b * b


def arcface_kernel(hit_ref, x_ref, w_ref, sx_ref, iwn_ref, lbl_ref, out_ref, *,
                   scale, cos_m, sin_m, s_thresh, s_mm, s_sq, grid_n, tile_n):
    """Computes one (b_tile, n_tile) tile of the scaled ArcFace logits."""
    # MXU: (b_tile, D) x (n_tile, D) contracting D of both -> (b_tile, n_tile)
    # f32 accumulator.  NT contraction (same form as q@k^T in flash attention);
    # alternatively store the weight pre-transposed [D, N] and contract (1, 0).
    dot = lax.dot_general(x_ref[...], w_ref[...],
                          dimension_numbers=(((1,), (1,)), ((), ())),
                          preferred_element_type=jnp.float32)

    # Scaled cosine: per-column 1/||w|| and per-row scale/||x|| (precomputed).
    cos_s = dot * iwn_ref[...] * sx_ref[...]          # (b_tile, n_tile) f32
    out_ref[...] = cos_s.astype(out_ref.dtype)        # common (miss) path

    i = pl.program_id(0)
    j = pl.program_id(1)
    hit = hit_ref[i * grid_n + j]                     # scalar from SMEM

    # Margin epilogue only when some label of this batch tile lands in this
    # class tile (easy_margin=False default branch):
    #   label column: phi if cos > thresh else cos - mm;  otherwise: cos.
    @pl.when(hit != 0)
    def _():
        col = lax.broadcasted_iota(jnp.int32, cos_s.shape, 1) + j * tile_n
        is_label = col == lbl_ref[...]                # (b_tile, n_tile)
        c = jnp.clip(cos_s, -scale, scale)            # = scale * clip(cos,-1,1)
        sin_s = jnp.sqrt(jnp.maximum(s_sq - c * c, 0.0))   # = scale * sin(theta)
        phi_s = c * cos_m - sin_s * sin_m             # = scale * cos(theta + m)
        adj = jnp.where(cos_s > s_thresh, phi_s, cos_s - s_mm)
        out_ref[...] = jnp.where(is_label, adj, cos_s).astype(out_ref.dtype)


def arcface_forward(x, weight, label, *, scale=64.0, margin=0.5,
                    tile_b=256, tile_n=1024, matmul_dtype=jnp.bfloat16,
                    interpret=False):
    """x: [B, D], weight: [N, D], label: [B] int -> {'logits': [B, N] f32}."""
    B, D = x.shape
    N, D2 = weight.shape
    assert D == D2, "feature dims must match"

    scale = float(scale)
    thresh = math.cos(math.pi - margin)
    mm = math.sin(math.pi - margin) * margin
    mm_dtype = jnp.dtype(matmul_dtype)
    eps = 1e-12

    # Tile sizes: sublane-multiple batch tile (16 for 2-byte operand packing),
    # lane-multiple class tile.
    sub = 16 if mm_dtype.itemsize < 4 else 8
    b_tile = min(_round_up(B, sub), _round_up(tile_b, sub))
    n_tile = min(_round_up(N, 128), _round_up(tile_n, 128))
    grid = (pl.cdiv(B, b_tile), pl.cdiv(N, n_tile))
    gi, gj = grid

    # Row norms from the ORIGINAL f32 values (not the rounded matmul dtype);
    # scale is folded into the x-side factor, so no full-tile scale multiply.
    x32 = x.astype(jnp.float32)
    w32 = weight.astype(jnp.float32)
    sinv_x = scale * lax.rsqrt(
        jnp.maximum(jnp.sum(x32 * x32, axis=1, keepdims=True), eps))      # (B, 1)
    inv_wn = lax.rsqrt(
        jnp.maximum(jnp.sum(w32 * w32, axis=1), eps)).reshape(1, N)       # (1, N)

    # Per-(batch-tile, class-tile) hit bitmap, read from SMEM via scalar prefetch.
    lbl = label.astype(jnp.int32)
    row_tile = jnp.arange(B, dtype=jnp.int32) // b_tile
    col_tile = jnp.clip(lbl, 0, N - 1) // n_tile
    hit_map = jnp.zeros((gi * gj,), jnp.int32).at[row_tile * gj + col_tile].set(1)

    # Operands stream from HBM in matmul_dtype (bf16 halves weight bytes);
    # no padding / concatenation passes over the weight matrix.
    xq = x if x.dtype == mm_dtype else x.astype(mm_dtype)
    wq = weight if weight.dtype == mm_dtype else weight.astype(mm_dtype)
    lbl2 = lbl.reshape(B, 1)

    kernel = functools.partial(
        arcface_kernel,
        scale=scale, cos_m=math.cos(margin), sin_m=math.sin(margin),
        s_thresh=scale * thresh, s_mm=scale * mm, s_sq=scale * scale,
        grid_n=gj, tile_n=n_tile)

    # VMEM budget: double-buffered tiles + f32 epilogue temporaries, clamped to
    # the actual device VMEM capacity (64 MiB on v7x) minus headroom.
    item = mm_dtype.itemsize
    est = (2 * b_tile * D * item           # x tile (double-buffered)
           + 2 * n_tile * D * item         # weight tile (double-buffered)
           + 4 * b_tile * 128 * 4          # sinv_x + label tiles (lane-padded)
           + 2 * 8 * n_tile * 4            # inv_wn tile (sublane-padded)
           + 2 * b_tile * n_tile * 4       # output tile
           + 4 * b_tile * n_tile * 4)      # f32/bool epilogue temporaries
    try:
        cap = pltpu.get_tpu_info().vmem_capacity_bytes
    except Exception:
        cap = 64 << 20                     # conservative (v7x per-TC)
    vmem_limit = int(min(cap - (8 << 20), max(32 << 20, 2 * est)))

    logits = pl.pallas_call(
        kernel,
        out_shape=jax.ShapeDtypeStruct((B, N), jnp.float32),
        grid_spec=pltpu.PrefetchScalarGridSpec(
            num_scalar_prefetch=1,
            grid=grid,
            in_specs=[
                pl.BlockSpec((b_tile, D), lambda i, j, hm: (i, 0)),   # x: resident over j
                pl.BlockSpec((n_tile, D), lambda i, j, hm: (j, 0)),   # weight: streams over j
                pl.BlockSpec((b_tile, 1), lambda i, j, hm: (i, 0)),   # scale/||x||
                pl.BlockSpec((1, n_tile), lambda i, j, hm: (0, j)),   # 1/||w||
                pl.BlockSpec((b_tile, 1), lambda i, j, hm: (i, 0)),   # label
            ],
            out_specs=pl.BlockSpec((b_tile, n_tile), lambda i, j, hm: (i, j)),
        ),
        compiler_params=pltpu.CompilerParams(
            dimension_semantics=("parallel", "parallel"),
            vmem_limit_bytes=vmem_limit),
        interpret=interpret,
    )(hit_map, xq, wq, sinv_x, inv_wn, lbl2)

    return {"logits": logits}


def arcface_ref(x, weight, label, *, scale=64.0, margin=0.5):
    """Pure-JAX reference mirroring the PyTorch easy_margin=False branch."""
    thresh = math.cos(math.pi - margin)
    mm = math.sin(math.pi - margin) * margin
    ex = x / jnp.linalg.norm(x, axis=1, keepdims=True)
    ew = weight / jnp.linalg.norm(weight, axis=1, keepdims=True)
    cos = ex @ ew.T
    N = weight.shape[0]
    onehot = jax.nn.one_hot(label, N, dtype=bool)
    above = cos > thresh
    a = jnp.where(onehot & above, margin, 0.0)
    b = jnp.where(onehot & ~above, -mm, 0.0)
    return scale * (jnp.cos(jnp.arccos(jnp.clip(cos, -1.0, 1.0)) + a) + b)


if __name__ == "__main__":
    # Small shapes consistent with the module: B samples, in_features=128,
    # out_features classes.
    B, D, N = 8, 128, 256
    scale, margin = 64.0, 0.5

    key = jax.random.PRNGKey(0)
    kx, kw, kl = jax.random.split(key, 3)
    x = jax.random.normal(kx, (B, D), dtype=jnp.float32)
    stdv = 1.0 / math.sqrt(D)     # PyTorch reset_parameters: uniform(-stdv, stdv)
    weight = jax.random.uniform(kw, (N, D), dtype=jnp.float32,
                                minval=-stdv, maxval=stdv)
    label = jax.random.randint(kl, (B,), 0, N, dtype=jnp.int32)

    ref = arcface_ref(x, weight, label, scale=scale, margin=margin)

    # 1) f32 operands, small class tile -> 2 class tiles, exercises the
    #    scalar-prefetch hit/miss epilogue gate.
    out = arcface_forward(x, weight, label, scale=scale, margin=margin,
                          matmul_dtype=jnp.float32, tile_n=128)
    logits = jax.block_until_ready(out["logits"])
    assert logits.shape == (B, N)
    assert jnp.allclose(logits, ref, atol=1e-2, rtol=1e-3), "f32 mismatch vs reference"

    # 2) Ragged shapes (B=5, N=300): partial blocks on both grid axes, no
    #    wrapper padding and no output slice.
    k2 = jax.random.PRNGKey(1)
    k2x, k2w, k2l = jax.random.split(k2, 3)
    B2, N2 = 5, 300
    x2 = jax.random.normal(k2x, (B2, D), dtype=jnp.float32)
    w2 = jax.random.uniform(k2w, (N2, D), dtype=jnp.float32, minval=-stdv, maxval=stdv)
    l2 = jax.random.randint(k2l, (B2,), 0, N2, dtype=jnp.int32)
    out2 = arcface_forward(x2, w2, l2, scale=scale, margin=margin,
                           matmul_dtype=jnp.float32, tile_n=128)
    logits2 = jax.block_until_ready(out2["logits"])
    ref2 = arcface_ref(x2, w2, l2, scale=scale, margin=margin)
    assert logits2.shape == (B2, N2)
    assert jnp.allclose(logits2, ref2, atol=1e-2, rtol=1e-3), "ragged-shape mismatch"

    # 3) Default bf16 operand streaming (HBM-bandwidth win on all generations);
    #    f32 norms and f32 accumulation, loose check vs f32 reference.
    k3 = jax.random.PRNGKey(2)
    k3x, k3w, k3l = jax.random.split(k3, 3)
    B3, N3 = 16, 512
    x3 = jax.random.normal(k3x, (B3, D), dtype=jnp.float32)
    w3 = jax.random.uniform(k3w, (N3, D), dtype=jnp.float32, minval=-stdv, maxval=stdv)
    l3 = jax.random.randint(k3l, (B3,), 0, N3, dtype=jnp.int32)
    out_bf = arcface_forward(x3, w3, l3, scale=scale, margin=margin, tile_n=256)
    logits_bf = jax.block_until_ready(out_bf["logits"])
    ref_bf = arcface_ref(x3, w3, l3, scale=scale, margin=margin)
    assert logits_bf.shape == (B3, N3)
    assert bool(jnp.isfinite(logits_bf).all())
    assert float(jnp.max(jnp.abs(logits_bf - ref_bf))) < 1.0, "bf16 path diverged"

    print("KERNEL_OK")
</pallas_src>

<mosaic_0001>
module attributes {stable_mosaic.version = 11 : i64} {
  func.func @arcface_kernel(%arg0: i32, %arg1: i32, %arg2: memref<2xi32, #tpu.memory_space<smem>>, %arg3: memref<8x128xf32, #tpu.memory_space<vmem>>, %arg4: memref<128x128xf32, #tpu.memory_space<vmem>>, %arg5: memref<8x1xf32, #tpu.memory_space<vmem>>, %arg6: memref<1x128xf32, #tpu.memory_space<vmem>>, %arg7: memref<8x1xi32, #tpu.memory_space<vmem>>, %arg8: memref<8x128xf32, #tpu.memory_space<vmem>>) attributes {dimension_semantics = [#tpu.dimension_semantics<parallel>, #tpu.dimension_semantics<parallel>], iteration_bounds = array<i64: 1, 2>, scalar_prefetch = 1 : i64, scratch_operands = 0 : i64, tpu.core_type = #tpu.core_type<tc>, window_params = [{transform_indices = @transform_0, window_bounds = array<i64: 8, 128>}, {transform_indices = @transform_1, window_bounds = array<i64: 128, 128>}, {transform_indices = @transform_2, window_bounds = array<i64: 8, 1>}, {transform_indices = @transform_3, window_bounds = array<i64: 1, 128>}, {transform_indices = @transform_4, window_bounds = array<i64: 8, 1>}, {transform_indices = @transform_5, window_bounds = array<i64: 8, 128>}]} {
    %c0 = arith.constant 0 : index
    %c0_0 = arith.constant 0 : index
    %0 = vector.load %arg3[%c0, %c0_0] : memref<8x128xf32, #tpu.memory_space<vmem>>, vector<8x128xf32>
    %c0_1 = arith.constant 0 : index
    %c0_2 = arith.constant 0 : index
    %1 = vector.load %arg4[%c0_1, %c0_2] : memref<128x128xf32, #tpu.memory_space<vmem>>, vector<128x128xf32>
    %cst = arith.constant dense<0.000000e+00> : vector<8x128xf32>
    %2 = tpu.matmul %0, %1, %cst {dimension_numbers = #tpu.dot_dimension_numbers<[1], [1], [0], [0], [0, 0, 1, 0], [], []>} : vector<8x128xf32>, vector<128x128xf32>, vector<8x128xf32> -> vector<8x128xf32>
    %c0_3 = arith.constant 0 : index
    %c0_4 = arith.constant 0 : index
    %3 = vector.load %arg6[%c0_3, %c0_4] : memref<1x128xf32, #tpu.memory_space<vmem>>, vector<1x128xf32>
    %4 = vector.broadcast %3 : vector<1x128xf32> to vector<8x128xf32>
    %5 = arith.mulf %2, %4 : vector<8x128xf32>
    %c0_5 = arith.constant 0 : index
    %c0_6 = arith.constant 0 : index
    %6 = vector.load %arg5[%c0_5, %c0_6] : memref<8x1xf32, #tpu.memory_space<vmem>>, vector<8x1xf32>
    %7 = vector.broadcast %6 : vector<8x1xf32> to vector<8x128xf32>
    %8 = arith.mulf %5, %7 : vector<8x128xf32>
    %c0_7 = arith.constant 0 : index
    %c0_8 = arith.constant 0 : index
    %9 = vector.load %arg8[%c0_7, %c0_8] : memref<8x128xf32, #tpu.memory_space<vmem>>, vector<8x128xf32>
    tpu.vector_store %arg8[%c0_7, %c0_8], %8 {strides = array<i32>} : memref<8x128xf32, #tpu.memory_space<vmem>>, vector<8x128xf32>,
    %c2_i32 = arith.constant 2 : i32
    %10 = arith.muli %arg0, %c2_i32 : i32
    %11 = arith.addi %10, %arg1 : i32
    %12 = arith.index_cast %11 : i32 to index
    %13 = memref.load %arg2[%12] : memref<2xi32, #tpu.memory_space<smem>>
    %c0_i32 = arith.constant 0 : i32
    %14 = arith.cmpi ne, %13, %c0_i32 : i32
    %15 = arith.extui %14 : i1 to i32
    %c0_i32_9 = arith.constant 0 : i32
    %16 = arith.cmpi ne, %15, %c0_i32_9 : i32
    scf.if %16 {
      %17 = tpu.iota {dimensions = array<i32: 1>} : vector<8x128xi32>
      %c128_i32 = arith.constant 128 : i32
      %18 = arith.muli %arg1, %c128_i32 : i32
      %19 = vector.broadcast %18 : i32 to vector<8x128xi32>
      %20 = arith.addi %17, %19 : vector<8x128xi32>
      %c0_10 = arith.constant 0 : index
      %c0_11 = arith.constant 0 : index
      %21 = vector.load %arg7[%c0_10, %c0_11] : memref<8x1xi32, #tpu.memory_space<vmem>>, vector<8x1xi32>
      %22 = vector.broadcast %21 : vector<8x1xi32> to vector<8x128xi32>
      %23 = arith.cmpi eq, %20, %22 : vector<8x128xi32>
      %cst_12 = arith.constant -6.400000e+01 : f32
      %cst_13 = arith.constant 6.400000e+01 : f32
      %24 = vector.broadcast %cst_12 : f32 to vector<8x128xf32>
      %25 = arith.maximumf %24, %8 : vector<8x128xf32>
      %26 = vector.broadcast %cst_13 : f32 to vector<8x128xf32>
      %27 = arith.minimumf %26, %25 : vector<8x128xf32>
      %28 = arith.mulf %27, %27 : vector<8x128xf32>
      %cst_14 = arith.constant 4.096000e+03 : f32
      %29 = vector.broadcast %cst_14 : f32 to vector<8x128xf32>
      %30 = arith.subf %29, %28 : vector<8x128xf32>
      %cst_15 = arith.constant 0.000000e+00 : f32
      %31 = vector.broadcast %cst_15 : f32 to vector<8x128xf32>
      %32 = arith.maximumf %30, %31 : vector<8x128xf32>
      %33 = math.sqrt %32 : vector<8x128xf32>
      %cst_16 = arith.constant 0.87758255 : f32
      %34 = vector.broadcast %cst_16 : f32 to vector<8x128xf32>
      %35 = arith.mulf %27, %34 : vector<8x128xf32>
      %cst_17 = arith.constant 0.47942555 : f32
      %36 = vector.broadcast %cst_17 : f32 to vector<8x128xf32>
      %37 = arith.mulf %33, %36 : vector<8x128xf32>
      %38 = arith.subf %35, %37 : vector<8x128xf32>
      %cst_18 = arith.constant -56.1652832 : f32
      %39 = vector.broadcast %cst_18 : f32 to vector<8x128xf32>
      %40 = arith.cmpf ogt, %8, %39 : vector<8x128xf32>
      %cst_19 = arith.constant 15.3416176 : f32
      %41 = vector.broadcast %cst_19 : f32 to vector<8x128xf32>
      %42 = arith.subf %8, %41 : vector<8x128xf32>
      %43 = arith.select %40, %38, %42 : vector<8x128xi1>, vector<8x128xf32>
      %44 = arith.select %23, %43, %8 : vector<8x128xi1>, vector<8x128xf32>
      %c0_20 = arith.constant 0 : index
      %c0_21 = arith.constant 0 : index
      %45 = vector.load %arg8[%c0_20, %c0_21] : memref<8x128xf32, #tpu.memory_space<vmem>>, vector<8x128xf32>
      tpu.vector_store %arg8[%c0_20, %c0_21], %44 {strides = array<i32>} : memref<8x128xf32, #tpu.memory_space<vmem>>, vector<8x128xf32>,
    } else {
    }
    return
  }
  func.func @transform_0(%arg0: i32, %arg1: i32, %arg2: memref<2xi32, #tpu.memory_space<smem>>) -> (i32, i32) {
    %c0_i32 = arith.constant 0 : i32
    %c0_i32_0 = arith.constant 0 : i32
    return %arg0, %c0_i32 : i32, i32
  }
  func.func @transform_1(%arg0: i32, %arg1: i32, %arg2: memref<2xi32, #tpu.memory_space<smem>>) -> (i32, i32) {
    %c0_i32 = arith.constant 0 : i32
    %c0_i32_0 = arith.constant 0 : i32
    return %arg1, %c0_i32 : i32, i32
  }
  func.func @transform_2(%arg0: i32, %arg1: i32, %arg2: memref<2xi32, #tpu.memory_space<smem>>) -> (i32, i32) {
    %c0_i32 = arith.constant 0 : i32
    %c0_i32_0 = arith.constant 0 : i32
    return %arg0, %c0_i32 : i32, i32
  }
  func.func @transform_3(%arg0: i32, %arg1: i32, %arg2: memref<2xi32, #tpu.memory_space<smem>>) -> (i32, i32) {
    %c0_i32 = arith.constant 0 : i32
    %c0_i32_0 = arith.constant 0 : i32
    return %c0_i32, %arg1 : i32, i32
  }
  func.func @transform_4(%arg0: i32, %arg1: i32, %arg2: memref<2xi32, #tpu.memory_space<smem>>) -> (i32, i32) {
    %c0_i32 = arith.constant 0 : i32
    %c0_i32_0 = arith.constant 0 : i32
    return %arg0, %c0_i32 : i32, i32
  }
  func.func @transform_5(%arg0: i32, %arg1: i32, %arg2: memref<2xi32, #tpu.memory_space<smem>>) -> (i32, i32) {
    %c0_i32 = arith.constant 0 : i32
    return %arg0, %arg1 : i32, i32
  }
}

</mosaic_0001>

<bundles_post_ra>
// kernel: tpu_custom_call.1
= control target key start
LH: loop header
LB: loop body
LE: loop exit
PB: predicated region body
PF: predicated region fallthrough
CT: control target
= control target key end

     0   :  { %s1179_s0 = inlined_call_operand.vmem [shape: s32[2], index: 0, kind: input, shape index: {}]   ;;  %s1180_s1 = inlined_call_operand.vmem [shape: f32[8,128], index: 1, kind: input, shape index: {}]   ;;  %s1181_s2 = inlined_call_operand.hbm [shape: f32[256,128], index: 2, kind: input, shape index: {}]   ;;  %s1182_s3 = inlined_call_operand.vmem [shape: f32[8,1], index: 3, kind: input, shape index: {}]   ;;  %s1183_s4 = inlined_call_operand.vmem [shape: f32[1,256], index: 4, kind: input, shape index: {}]   ;;  %s1184_s5 = inlined_call_operand.vmem [shape: s32[8,1], index: 5, kind: input, shape index: {}]   ;;  %s1185_s6 = inlined_call_operand.hbm [shape: f32[8,256], index: 6, kind: output, shape index: {}]  }
   0x1   :  { %s11_s23 = sshll.u32 %s1179_s0, 4  ;;  %s12_s23 = int_to_ptr.vmem [resolvable:$true] %s11_s23 }
   0x2   :  { %s793_s24 = scalar_lea.vmem %s12_s23, 16  ;;  %p798_p1 = scmp.lt.s32.totalorder %s12_s23, %s12_s23 }
   0x3   :  { %p794_p0 = scmp.ne.s32.totalorder %s12_s23, %s793_s24  ;;  %p799_p2 = scmp.lt.s32.totalorder %s793_s24, %s793_s24 }
   0x5   :  { %p800_p3 = por %p799_p2, %p798_p1 }
   0x7   :  { %p801_p4 = pnand %p800_p3, %p794_p0 }
   0x9   :  { %804 = shalt.err (!%p801_p4)  }
   0xa   :  { %s921_s25 = smov [#allocation3]  }
   0xb   :  { %14 = dma.vmem_to_smem %s12_s23, 16, %s921_s25, [#allocation2] }
   0xc   :  { %887 = dma.done.wait [#allocation2], 16 }
   0xd   :  { %888 = vsyncadd [#allocation2], 4294967280 }
   0xe   :  { %16 = sfence }
   0xf   :  { %17 = vsyncpa [#allocation5], 0 }
  0x10   :  { %19 = vsyncpa [#allocation5 + $0x1], 0 }
  0x11   :  { %20 = vsyncpa [#allocation6], 0 }
  0x12   :  { %22 = vsyncpa [#allocation6 + $0x1], 0  ;;  %s969_s26 = smov 0   ;;  %s971_s0 = smov 0  }
  0x13   :  { %s973_s27 = smov 0   ;;  %s975_s28 = smov 0  }
  0x14   :  { %s977_s29 = smov 0   ;;  %s979_s30 = smov 0  }
  0x15 LB: > { %s620_s7 = sadd.s32 4294967295, %s919_s30   ;;  %s621_s8 = sadd.s32 4294967294, %s919_s30   ;;  %s919_s30 = sphi %s979_s30, %s28_s30   ;;  %s915_s29 = sphi %s977_s29, %s1200_s29   ;;  %s911_s28 = sphi %s975_s28, %s1199_s28   ;;  %s907_s27 = sphi %s973_s27, %s1198_s27   ;;  %s903_s0 = sphi %s971_s0, %s1197_s0   ;;  %s899_s26 = sphi %s969_s26, %s1196_s26  }
  0x16   : > { %s37_s9 = sadd.s32 1, %s915_s29  ;;  %s73_s10 = sadd.s32 1, %s907_s27 }
  0x17   : > { %p38_p5 = scmp.ge.s32.totalorder %s37_s9, 2  ;;  %p80_p6 = scmp.ne.s32.totalorder %s907_s27, %s903_s0 }
  0x18   : > { %p81_p7 = scmp.eq.s32.totalorder %s919_s30, 0  ;;  %p86_p8 = scmp.ne.s32.totalorder %s903_s0, %s899_s26 }
  0x19   : > { %s1202_s9 = smov (%p38_p5, %s37_s9), 0  ;;  %p87_p10 = scmp.eq.s32.totalorder %s620_s7, 0 }
  0x1a   : > { %p1010_p9 = por %p81_p7, %p80_p6  ;;  %s70_s12 = ssub.s32 %s915_s29, %s1202_s9 }
  0x1b   : > { %p190_p11 = scmp.eq.s32.totalorder %s620_s7, 1  ;;  %p71_p12 = scmp.eq.s32.totalorder %s70_s12, 0 }
  0x1c   : > { %p1016_p13 = por %p87_p10, %p86_p8  ;;  %p196_p1 = scmp.eq.s32.totalorder %s621_s8, 1 }
  0x1d   : > { %p1020_p0 = por %p190_p11, %p80_p6  ;;  %p731_p4 = scmp.lt.s32.totalorder %s919_s30, 2 }
  0x1e   : > { %s1025_s15 = scalar_select %p71_p12, %s907_s27, %s73_s10  }
  0x1f   : > { %s1189_s14 = scalar_select %p1020_p0, 1, 0 }
  0x20   : > { %p1027_p2 = por %p196_p1, %p86_p8  ;;  %s237_s17 = sand.u32 1, %s907_s27  }
  0x21   : > { %s627_s18 = sshll.u32 %s237_s17, 7  ;;  %s642_s19 = sshll.u32 %s915_s29, 11 }
  0x22   : > { %s1190_s16 = scalar_select %p1027_p2, 1, 0 }
  0x23   : > { %s1038_s22 = scalar_lea.hbm %s1181_s2, %s642_s19  ;;  %s241_s23 = scalar_lea.vmem [#allocation4], %s627_s18 }
  0x24   : > { %s248_s24 = sshll.u32 %s241_s23, 4  ;;  %p1044_p5 = pnand %p731_p4, %p1010_p9  ;;  %s1040_s24 = int_to_ptr.vmem [resolvable:$true] %s248_s24 }
  0x25   : > { %s1049_s7 = scalar_lea.sflag [#allocation5], %s237_s17  ;;  %s805_s8 = scalar_lea.hbm %s1038_s22, 2048 }
  0x26   : > { %p806_p7 = scmp.ne.s32.totalorder %s1038_s22, %s805_s8  ;;  %p807_p8 = pneg %p1044_p5 }
  0x27   : > { %s810_s11 = scalar_lea.hbm %s1181_s2, 4096  ;;  %p811_p9 = scmp.lt.u32.totalorder %s1038_s22, %s1181_s2 }
  0x28   : > { %p808_p10 = pnand %p807_p8, %p806_p7  ;;  %p812_p12 = scmp.lt.u32.totalorder %s810_s11, %s805_s8 }
  0x29   : > { %p814_p4 = scmp.lt.u32.totalorder %s805_s8, %s1038_s22 }
  0x2a   : > { %p809_p11 = pneg %p808_p10  ;;  %p813_p1 = por %p812_p12, %p811_p9 }
  0x2c   : > { %p815_p3 = por %p814_p4, %p813_p1 }
  0x2e   : > { %p816_p6 = pnand %p815_p3, %p809_p11 }
  0x30   : > { %819 = shalt.err (!%p816_p6)
}
  0x31   : > { %s820_s17 = scalar_lea.vmem %s1040_s24, 2048  ;;  %s922_s20 = smov [#allocation4]  }
  0x32   : > { %p821_p7 = scmp.ne.s32.totalorder %s1040_s24, %s820_s17  ;;  %s825_s21 = sshll.u32 %s922_s20, 4  ;;  %s826_s21 = int_to_ptr.vmem [resolvable:$false] %s825_s21 }
  0x33   : > { %s827_s23 = scalar_lea.vmem %s826_s21, 4096  ;;  %p828_p0 = scmp.lt.s32.totalorder %s1040_s24, %s826_s21 }
  0x34   : > { %p823_p10 = pnand %p821_p7, %p807_p8  ;;  %p829_p9 = scmp.lt.s32.totalorder %s827_s23, %s820_s17 }
  0x36   : > { %p824_p2 = pneg %p823_p10  ;;  %p830_p12 = por %p829_p9, %p828_p0 }
  0x38   : > { %p831_p1 = pnand %p830_p12, %p824_p2 }
  0x3a   : > { %834 = shalt.err (!%p831_p1)
}
  0x3b   : > { %s923_s8 = smov 128   ;;  %s924_s10 = smov 8  }
  0x3c   : > { %726 = dma.hbm_to_vmem [thread:$0]  (!%p1044_p5), %s1038_s22, 2048, %s1040_s24, %s1049_s7, %s923_s8, %s923_s8, %s924_s10  }
  0x3d   : > { %p262_p3 = scmp.lt.s32.totalorder %s919_s30, 3  ;;  %p1192_p6 = scmp.ge.s32.totalorder %s919_s30, 1 }
  0x3f   : > { %p263_p8 = pnand %p1192_p6, %p262_p3 }
  0x40   : > { %s1081_s12 = sand.u32 (!%p263_p8), 1, %s903_s0  }
  0x41   : > { %266 = sbr.rel (%p263_p8) target bundleno = 411 (0x19b), region = 40  ;;  %s631_s11 = sshll.u32 (!%p263_p8), %s1081_s12, 7 }
  0x42   : > { %s269_s18 = scalar_lea.sflag (!%p263_p8), [#allocation5], %s1081_s12  ;;  %s1085_s19 = scalar_lea.vmem (!%p263_p8), [#allocation4], %s631_s11 }
  0x48   : > { %890 = dma.done.wait (%p1016_p13), %s269_s18, 2048  }
  0x49   : > { %892 = vsyncadd (%p1016_p13), %s269_s18, 4294965248  ;;  %s1092_s22 = sld [smem:[#allocation3 + %s911_s28]]  ;;  %v925_v0 = vmov 0.0|0.0   ;;  %vm926_vm0 = vmmov 0   ;;  %v927_v1 = vmov 0.0   ;;  %v928_v2 = vmov 0  }
  0x4a   : > { %695 = vmatprep.subr.bf16.mxu0 %v925_v0  ;;  %692 = vmatprep.mubr.msk.f32.mxu0 %vm926_vm0, %v927_v1  ;;  %v331_v3 = vld [vmem:[%s1085_s19] sm:$0xff]  ;;  %v332_v4 = vld [vmem:[%s1085_s19 + $0x8] sm:$0xff]  ;;  %v333_v6 = vld [vmem:[%s1085_s19 + $0x10] sm:$0xff]  ;;  %p323_p13 = scmp.lt.s32.totalorder %s911_s28, 1  ;;  %s632_s8 = sshll.u32 %s1081_s12, 3 }
  0x4b   : > { %789 = vset.pattern.permute.xlu0 %v928_v2  ;;  %v696_v5 = vpack.c.bf16 %v332_v4, %v331_v3  ;;  %v334_v7 = vld [vmem:[%s1085_s19 + $0x18] sm:$0xff]  ;;  %v425_v8 = vld [vmem:[%s1182_s3] sm:$0xff]  ;;  %v336_v11 = vld [vmem:[%s1085_s19 + $0x28] sm:$0xff]  ;;  %s1122_s10 = scalar_lea.vmem [#allocation7], %s632_s8 }
  0x4c   : > { %428 = vperm.xlu0 %789, %v425_v8   ;;  %v699_v9 = vpack.c.bf16 %v334_v7, %v333_v6  ;;  %v335_v10 = vld [vmem:[%s1085_s19 + $0x20] sm:$0xff]  ;;  %v337_v13 = vld [vmem:[%s1085_s19 + $0x30] sm:$0xff]  ;;  %v338_v14 = vld [vmem:[%s1085_s19 + $0x38] sm:$0xff]  ;;  %s324_s17 = scalar_select %p323_p13, %s911_s28, 1 }
  0x4d   : > { %697 = vmatpush3.bf16.xpose.msra.mxu0 %v696_v5  ;;  %v702_v12 = vpack.c.bf16 %v336_v11, %v335_v10  ;;  %v705_v15 = vpack.c.bf16 %v338_v14, %v337_v13  ;;  %v339_v16 = vld [vmem:[%s1085_s19 + $0x40] sm:$0xff]  ;;  %v340_v17 = vld [vmem:[%s1085_s19 + $0x48] sm:$0xff]  ;;  %v341_v19 = vld [vmem:[%s1085_s19 + $0x50] sm:$0xff] }
  0x4e   : > { %698 = vmatprep.subr.bf16.mxu0 %v925_v0  ;;  %v708_v18 = vpack.c.bf16 %v340_v17, %v339_v16  ;;  %v342_v20 = vld [vmem:[%s1085_s19 + $0x58] sm:$0xff]  ;;  %v343_v22 = vld [vmem:[%s1085_s19 + $0x60] sm:$0xff]  ;;  %v344_v23 = vld [vmem:[%s1085_s19 + $0x68] sm:$0xff]  ;;  %s325_s23 = scalar_lea.vmem %s1183_s4, %s324_s17 }
  0x4f   : > { %v711_v21 = vpack.c.bf16 %v342_v20, %v341_v19  ;;  %v714_v24 = vpack.c.bf16 %v344_v23, %v343_v22  ;;  %v345_v25 = vld [vmem:[%s1085_s19 + $0x70] sm:$0xff]  ;;  %v346_v26 = vld [vmem:[%s1085_s19 + $0x78] sm:$0xff]  ;;  %v330_v28 = vld [vmem:[%s1180_s1] sm:$0xff]  ;;  %p634_p0 = scmp.eq.s32.totalorder %s1092_s22, 0 }
  0x50   : > { %v717_v27 = vpack.c.bf16 %v346_v26, %v345_v25  ;;  %v633_v29 = vld [vmem:[%s325_s23] ss:$0 sm:$0xff]  ;;  %v929_v36 = vmov (!%p634_p0), 0   ;;  %v440_v46 = vlaneseq (!%p634_p0)  ;;  %s635_s19 = sshll.u32 (!%p634_p0), %s911_s28, 7 }
  0x51   : > { %v445_v35 = vld [vmem:[%s1184_s5] sm:$0xff] (!%p634_p0)  ;;  %790 = vset.pattern.permute.xlu0 (!%p634_p0), %v929_v36  ;;  %v443_v50 = vstv (!%p634_p0), %s635_s19 }
  0x52   : > { %447 = vperm.xlu0 (!%p634_p0), %790, %v445_v35   ;;  %v441_v49 = vand.u32 (!%p634_p0), 127, %v440_v46 }
  0x54   : > { %v444_v53 = vadd.s32 (!%p634_p0), %v443_v50, %v441_v49 }
  0x55   : > { %700 = vmatpush3.bf16.xpose.msra.mxu0 %v699_v9 }
  0x56   : > { %701 = vmatprep.subr.bf16.mxu0 %v925_v0 }
  0x5d   : > { %703 = vmatpush3.bf16.xpose.msra.mxu0 %v702_v12 }
  0x5e   : > { %704 = vmatprep.subr.bf16.mxu0 %v925_v0 }
  0x65   : > { %706 = vmatpush3.bf16.xpose.msra.mxu0 %v705_v15 }
  0x66   : > { %707 = vmatprep.subr.bf16.mxu0 %v925_v0 }
  0x6d   : > { %709 = vmatpush3.bf16.xpose.msra.mxu0 %v708_v18 }
  0x6e   : > { %710 = vmatprep.subr.bf16.mxu0 %v925_v0 }
  0x75   : > { %712 = vmatpush3.bf16.xpose.msra.mxu0 %v711_v21 }
  0x76   : > { %713 = vmatprep.subr.bf16.mxu0 %v925_v0 }
  0x7d   : > { %715 = vmatpush3.bf16.xpose.msra.mxu0 %v714_v24 }
  0x7e   : > { %716 = vmatprep.subr.bf16.mxu0 %v925_v0 }
  0x85   : > { %718 = vmatpush3.bf16.xpose.msra.mxu0 %v717_v27 }
  0x8c   : > { %693 = vmatmul.mubr.f32.vlgmr.msra.gmra.mrb[0].mxu0 %v330_v28 }
  0xcb   : > { %v429_v31 = vpop.permute.xlu0 %428 }
  0xd1   : > { %v448_v55 = vpop.permute.xlu0 (!%p634_p0), %447 }
  0xd2   : > { %vm449_vm4 = vcmp.eq.s32.totalorder (!%p634_p0), %v444_v53, %v448_v55 }
 0x15e   : > { %439 = sbr.rel (%p634_p0) target bundleno = 386 (0x182), region = 48 }
 0x15f   : > { %v413_v30 = vpop.f32.mrb[0].mxu0 }
 0x160   : > { %v424_v32 = vmul.f32 %v633_v29, %v413_v30  ;;  %v694_v33 = vpop.f32.mrb[1].mxu0 }
 0x162   : > { %v431_v34 = vmul.f32 %v429_v31, %v424_v32 }
 0x164   : > { %432 = vst [vmem:[%s1122_s10] sm:$0xff] %v431_v34  ;;  %v636_v37 = vclamps-f32 (!%p634_p0), %v431_v34, 64.0  ;;  %v637_v52 = vadd.f32 (!%p634_p0), -15.341618, %v431_v34  ;;  %vm465_vm3 = vcmp.gt.f32.partialorder (!%p634_p0), %v431_v34, -56.165283 }
 0x166   : > { %v452_v38 = vmul.f32 %v636_v37, %v636_v37  ;;  %v462_v47 = vmul.f32 0.87758255, %v636_v37 }
 0x168   : > { %v453_v39 = vsub.f32 4096.0, %v452_v38 }
 0x16a   : > { %v454_v40 = vmax.f32 %v453_v39, 0.0 }
 0x16c   : > { %791 = vrsqrt.f32 %v454_v40  ;;  %vm457_vm1 = vcmp.eq.f32.partialorder %v454_v40, inf  ;;  %v460_v43 = vand.u32 2147483648, %v454_v40  ;;  %vm459_vm2 = vcmp.eq.f32.partialorder %v454_v40, 0.0 }
 0x176   : > { %v792_v41 = vpop.eup %791 }
 0x177   : > { %v456_v42 = vmul.f32 %v792_v41, %v454_v40 }
 0x179   : > { %v458_v44 = vsel %vm457_vm1, %v454_v40, %v456_v42 }
 0x17a   : > { %v461_v45 = vsel %vm459_vm2, %v460_v43, %v458_v44 }
 0x17b   : > { %v463_v48 = vmul.f32 0.47942555, %v461_v45 }
 0x17d   : > { %v464_v51 = vsub.f32 %v462_v47, %v463_v48 }
 0x17f   : > { %v467_v54 = vsel %vm465_vm3, %v464_v51, %v637_v52 }
 0x180   : > { %v468_v56 = vsel %vm449_vm4, %v467_v54, %v431_v34 }
 0x181   : > { %469 = vst [vmem:[%s1122_s10] sm:$0xff] %v468_v56 }
 0x182 PF: > { %s639_s22 = sshll.u32 %s911_s28, 7  ;;  %s486_s7 = sshll.u32 %s1122_s10, 4  ;;  %s487_s7 = int_to_ptr.vmem [resolvable:$true] %s486_s7 }
 0x183   : > { %s1135_s25 = scalar_lea.hbm %s1185_s6, %s639_s22  ;;  %s471_s17 = scalar_lea.sflag [#allocation6], %s1081_s12 }
 0x184   : > { %s835_s20 = scalar_lea.vmem %s487_s7, 128  ;;  %p1193_p5 = scmp.ne.s32.totalorder %s1189_s14, 0 }
 0x185   : > { %p836_p2 = scmp.ne.s32.totalorder %s487_s7, %s835_s20  ;;  %s930_s21 = smov [#allocation7]  }
 0x186   : > { %s839_s23 = sshll.u32 %s930_s21, 4  ;;  %s840_s23 = int_to_ptr.vmem [resolvable:$false] %s839_s23 }
 0x187   : > { %p837_p11 = pnand %p836_p2, %p1193_p5  ;;  %s841_s8 = scalar_lea.vmem %s840_s23, 256 }
 0x188   : > { %p842_p7 = scmp.lt.s32.totalorder %s487_s7, %s840_s23  ;;  %p843_p10 = scmp.lt.s32.totalorder %s841_s8, %s835_s20 }
 0x189   : > { %p838_p4 = pneg %p837_p11 }
 0x18a   : > { %p844_p9 = por %p843_p10, %p842_p7 }
 0x18c   : > { %p845_p12 = pnand %p844_p9, %p838_p4 }
 0x18e   : > { %848 = shalt.err (!%p845_p12)
}
 0x18f   : > { %s849_s28 = scalar_lea.hbm %s1135_s25, 128  ;;  %s853_s11 = scalar_lea.hbm %s1185_s6, 256 }
 0x190   : > { %p850_p1 = scmp.ne.s32.totalorder %s1135_s25, %s849_s28  ;;  %p854_p8 = scmp.lt.u32.totalorder %s1135_s25, %s1185_s6 }
 0x191   : > { %p855_p13 = scmp.lt.u32.totalorder %s853_s11, %s849_s28  ;;  %p857_p2 = scmp.lt.u32.totalorder %s849_s28, %s1135_s25 }
 0x192   : > { %p851_p3 = pnand %p850_p1, %p1193_p5 }
 0x193   : > { %p856_p0 = por %p855_p13, %p854_p8 }
 0x194   : > { %p852_p6 = pneg %p851_p3 }
 0x195   : > { %p858_p11 = por %p857_p2, %p856_p0 }
 0x197   : > { %p859_p4 = pnand %p858_p11, %p852_p6 }
 0x199   : > { %862 = shalt.err (!%p859_p4)
}
 0x19a   : > { %721 = dma.vmem_to_hbm [thread:$0]  (%p1193_p5), %s487_s7, 128, %s1135_s25, %s471_s17  }
 0x19b PF: > { %s498_s22 = sand.u32 1, %s899_s26   ;;  %p1194_p7 = scmp.ne.s32.totalorder %s1190_s16, 0 }
 0x19c   : > { %p1195_p10 = scmp.ge.s32.totalorder %s919_s30, 2  ;;  %s499_s13 = scalar_lea.sflag [#allocation6], %s498_s22 }
 0x19e   : > { %p728_p9 = pnand %p1195_p10, %p1194_p7 }
 0x1a0   : > { %894 = dma.done.wait (!%p728_p9), %s499_s13, 128  }
 0x1a1   : > { %896 = vsyncadd (!%p728_p9), %s499_s13, 4294967168  ;;  %s28_s30 = sadd.s32 1, %s919_s30   ;;  %s1196_s26 = smov %s903_s0 }
 0x1a2   : > { %p25_p12 = scmp.ge.s32.totalorder %s28_s30, 4   ;;  %s1197_s0 = smov %s907_s27 }
 0x1a3   : > { %s1198_s27 = smov %s1025_s15  ;;  %s1199_s28 = smov %s915_s29 }
 0x1a4   : > { %s1200_s29 = smov %s1202_s9  ;;  %27 = sbr.rel (!%p25_p12) target bundleno = 21 (0x15), region = 101 }
 0x1ab   :  { %504 = vsyncpa [#allocation5], 1 }
 0x1ac   :  { %506 = vsyncpa [#allocation5 + $0x1], 1 }
 0x1ad   :  { %507 = vsyncpa [#allocation6], 1 }
 0x1ae   :  { %509 = vsyncpa [#allocation6 + $0x1], 1 }

</bundles_post_ra>
